<compile_context>
chip_gen: v6e
topology: v6e:2x2x1
jax: 0.10.0
libtpu: 0.0.40
codegen_flags: <defaults>
</compile_context>

<pallas_src>
import jax
import jax.numpy as jnp
from jax.experimental import pallas as pl
from jax.experimental.pallas import tpu as pltpu


# Below this size a Pallas launch is pure overhead; use a plain XLA copy.
_MIN_PALLAS_BYTES = 1024


def _dma_copy_kernel(x_hbm_ref, o_hbm_ref, sem):
    # Zero-compute copy: one direct HBM -> HBM DMA, no VMEM staging, no grid.
    cp = pltpu.make_async_copy(x_hbm_ref, o_hbm_ref, sem)
    cp.start()
    cp.wait()


def materialize_copy(x: jax.Array) -> jax.Array:
    """Bit-exact copy of `x` into a fresh buffer.

    Only needed when a distinct output buffer is explicitly required.  If
    aliasing is acceptable, simply reuse `x` (JAX arrays are immutable), which
    is what `no_encoder_forward` does — that strictly dominates any copy kernel.

    Large arrays: single HBM->HBM DMA inside a Pallas kernel (no VMEM pipeline,
    no per-tile overhead, VMEM limits irrelevant on all generations).
    Tiny arrays: plain XLA copy; a kernel launch would dominate the cost.
    """
    nbytes = x.size * jnp.dtype(x.dtype).itemsize
    if x.size == 0 or nbytes < _MIN_PALLAS_BYTES:
        # Tiny / degenerate: no Pallas launch, no masked lane-sparse stores.
        return jnp.array(x, copy=True)

    return pl.pallas_call(
        _dma_copy_kernel,
        out_shape=jax.ShapeDtypeStruct(x.shape, x.dtype),
        in_specs=[pl.BlockSpec(memory_space=pl.ANY)],   # raw HBM ref, no auto-DMA
        out_specs=pl.BlockSpec(memory_space=pl.ANY),    # raw HBM ref, no auto-DMA
        scratch_shapes=[pltpu.SemaphoreType.DMA(())],
        cost_estimate=pl.CostEstimate(
            flops=0,
            transcendentals=0,
            bytes_accessed=2 * nbytes,
        ),
    )(x)


def no_encoder_forward(src, mask=None, src_key_padding_mask=None, pos=None,
                       xyz=None, transpose_swap=False):
    """JAX equivalent of NoEncoder.forward: returns (xyz, src, None).

    Pure pass-through — no Pallas kernel, no copies.  Returning the same
    immutable arrays is the aliased "copy"; use `materialize_copy` only if a
    physically distinct buffer is required downstream.
    """
    return (xyz, src, None)


if __name__ == "__main__":
    key = jax.random.PRNGKey(0)
    k_src, k_xyz = jax.random.split(key)

    # Small shapes consistent with the encoder-style forward signature:
    # src: (seq=8, batch=2, hidden=32), xyz: (batch=2, npoints=8, 3)
    src = jax.random.normal(k_src, (8, 2, 32), dtype=jnp.float32)
    xyz = jax.random.normal(k_xyz, (2, 8, 3), dtype=jnp.float32)

    # 1) The actual NoEncoder forward: zero-cost pass-through, no kernel launch.
    xyz_out, src_out, third = no_encoder_forward(src, xyz=xyz)
    assert third is None
    assert src_out is src and xyz_out is xyz
    jax.block_until_ready(src_out)
    jax.block_until_ready(xyz_out)

    # 2) Demonstrate the optional materializing copy.
    #    src (2048 bytes)  -> single HBM->HBM DMA Pallas kernel.
    #    xyz (192 bytes)   -> tiny-array XLA-copy fallback (no Pallas launch).
    src_copy = materialize_copy(src)
    xyz_copy = materialize_copy(xyz)
    jax.block_until_ready(src_copy)
    jax.block_until_ready(xyz_copy)

    assert src_copy.shape == src.shape and src_copy.dtype == src.dtype
    assert xyz_copy.shape == xyz.shape and xyz_copy.dtype == xyz.dtype
    assert bool(jnp.all(src_copy == src))
    assert bool(jnp.all(xyz_copy == xyz))

    print("KERNEL_OK")
</pallas_src>

<mosaic_0001>
module attributes {stable_mosaic.version = 11 : i64} {
  func.func @_dma_copy_kernel(%arg0: memref<8x2x32xf32, #tpu.memory_space<any>>, %arg1: memref<8x2x32xf32, #tpu.memory_space<any>>, %arg2: memref<!tpu.dma_semaphore, #tpu.memory_space<semaphore_mem>>) attributes {dimension_semantics = [], scalar_prefetch = 0 : i64, scratch_operands = 1 : i64, tpu.core_type = #tpu.core_type<tc>} {
    tpu.enqueue_dma source(%arg0 : memref<8x2x32xf32, #tpu.memory_space<any>>) target(%arg1 : memref<8x2x32xf32, #tpu.memory_space<any>>) target_semaphore(%arg2 : memref<!tpu.dma_semaphore, #tpu.memory_space<semaphore_mem>>)
    tpu.wait_dma2 semaphore(%arg2 : memref<!tpu.dma_semaphore, #tpu.memory_space<semaphore_mem>>) src(%arg0 : memref<8x2x32xf32, #tpu.memory_space<any>>) dst(%arg1 : memref<8x2x32xf32, #tpu.memory_space<any>>)
    return
  }
}

</mosaic_0001>

<bundles_post_ra>
// kernel: tpu_custom_call.1
= control target key start
LH: loop header
LB: loop body
LE: loop exit
PB: predicated region body
PF: predicated region fallthrough
CT: control target
= control target key end

     0   :  { %s29_s6 = smov [#allocation2]   ;;  %s30_s7 = smov 131072   ;;  %s48_s0 = inlined_call_operand.hbm [shape: f32[8,2,32], index: 0, kind: input, shape index: {}]   ;;  %s49_s1 = inlined_call_operand.hbm [shape: f32[8,2,32], index: 1, kind: output, shape index: {}]  }
   0x1   :  { %s31_s8 = smov 0  }
   0x2   :  { %12 = dma.general %s48_s0, 256, %s49_s1, %s29_s6, %s30_s7, [#allocation4], %s31_s8, 0  }
   0x3   :  { %27 = dma.done.wait [#allocation2], 256 }
   0x4   :  { %28 = vsyncadd [#allocation2], 4294967040 }
   0x5   :  { %17 = vsyncmov [#allocation2] }
   0x8   :  { %s18_s13 = vpop.sfrf %17 }
   0x9   :  { %p23_p0 = scmp.ne.s32.totalorder %s18_s13, 0 }
   0xb   :  { %22 = shalt.err (%p23_p0)  }

</bundles_post_ra>
